<compile_context>
chip_gen: v5e
topology: v5e:2x2
jax: 0.10.0
libtpu: 0.0.40
codegen_flags: <defaults>
</compile_context>

<pallas_src>
import functools
from typing import NamedTuple

import jax
import jax.numpy as jnp
from jax import lax
from jax.experimental import pallas as pl
from jax.experimental.pallas import tpu as pltpu


def _round_up(x, m):
    return (x + m - 1) // m * m


class ClassifierParams(NamedTuple):
    w1c: jax.Array   # (D, ND*Hp)  bf16   W1 of all domains concatenated along out dim
    b1c: jax.Array   # (1, ND*Hp)  f32
    w2s: jax.Array   # (ND*Hp, Cp) bf16   W2 of all domains stacked along in dim
    b2p: jax.Array   # (ND, Cp)    f32
    d_model: int
    num_domains: int
    num_classes: int
    hidden_pad: int  # Hp
    class_pad: int   # Cp


def prepare_classifier_params(w1, b1, w2, b2):
    """Pack / pad / bf16-cast per-domain weights once, outside the serving path.

    w1: [ND, D, D]  input-major (x @ W convention, i.e. PyTorch Linear.weight.T)
    b1: [ND, D]
    w2: [ND, D, C]  (C = 2)
    b2: [ND, C]
    """
    ND, D, _ = w1.shape
    C = w2.shape[-1]
    Hp = _round_up(D, 128)
    Cp = _round_up(C, 128)

    # W1 concatenated along the output dim: column block d*Hp:(d+1)*Hp is domain d.
    w1c = jnp.zeros((ND, D, Hp), jnp.float32).at[:, :, :D].set(w1.astype(jnp.float32))
    w1c = jnp.transpose(w1c, (1, 0, 2)).reshape(D, ND * Hp).astype(jnp.bfloat16)
    # b1 concatenated the same way (added to every block; the mask discards the rest).
    b1c = jnp.zeros((ND, Hp), jnp.float32).at[:, :D].set(
        b1.astype(jnp.float32)).reshape(1, ND * Hp)
    # W2 stacked vertically so the masked hidden picks the right block.
    w2s = jnp.zeros((ND, Hp, Cp), jnp.float32).at[:, :D, :C].set(
        w2.astype(jnp.float32)).reshape(ND * Hp, Cp).astype(jnp.bfloat16)
    # b2 padded; selected per row inside the kernel.
    b2p = jnp.zeros((ND, Cp), jnp.float32).at[:, :C].set(b2.astype(jnp.float32))

    return ClassifierParams(w1c=w1c, b1c=b1c, w2s=w2s, b2p=b2p,
                            d_model=D, num_domains=ND, num_classes=C,
                            hidden_pad=Hp, class_pad=Cp)


def _classifier_kernel(feat_ref, dom_ref, w1c_ref, b1c_ref, w2s_ref, b2_ref,
                       out_ref, *, num_domains, hidden_pad):
    # feat_ref: (TILE_B, D)      bf16
    # dom_ref:  (TILE_B, 1)      int32
    # w1c_ref:  (D, ND*Hp)       bf16   (resident, constant index_map)
    # b1c_ref:  (1, ND*Hp)       f32
    # w2s_ref:  (ND*Hp, Cp)      bf16
    # b2_ref:   (ND, Cp)         f32
    # out_ref:  (TILE_B, Cp)     f32    (lane-dense)
    x = feat_ref[...]                                    # bf16
    dom = dom_ref[...]                                   # (TILE_B, 1) int32

    # Linear1 for all domains at once: (TILE_B, D) @ (D, ND*Hp) -> f32 acc.
    h = jnp.dot(x, w1c_ref[...], preferred_element_type=jnp.float32)
    h = h + b1c_ref[...]
    h = jnp.maximum(h, 0.0)                              # ReLU (dropout = identity)

    # Keep only the hidden block of each row's selected domain (VPU mask,
    # range compare -- avoids vector integer division).
    col = lax.broadcasted_iota(jnp.int32, h.shape, 1)    # (TILE_B, ND*Hp)
    lo = dom * hidden_pad                                # (TILE_B, 1)
    sel = (col >= lo) & (col < lo + hidden_pad)
    h = jnp.where(sel, h, 0.0)

    # Linear2 against the vertically stacked W2: (TILE_B, ND*Hp) @ (ND*Hp, Cp).
    y = jnp.dot(h.astype(jnp.bfloat16), w2s_ref[...],
                preferred_element_type=jnp.float32)

    # Per-row b2 selection; num_domains is tiny so a short select chain is cheap.
    b2 = b2_ref[...]                                     # (ND, Cp) f32
    bsel = jnp.zeros(out_ref.shape, jnp.float32)
    for d in range(num_domains):
        bsel = jnp.where(dom == d, b2[d:d + 1, :], bsel)
    out_ref[...] = (y + bsel).astype(out_ref.dtype)


def fake_news_classifier(feature, domain_ids, params: ClassifierParams):
    """
    feature:    [B, D] float
    domain_ids: [B] int
    params:     output of prepare_classifier_params (packed/padded weights)
    returns logits: [B, 2] float32
    """
    B, D = feature.shape
    assert D == params.d_model
    ND = params.num_domains
    Hp = params.hidden_pad
    Cp = params.class_pad
    C = params.num_classes

    # Big batch tiles amortize per-grid-step overhead; 16-row granularity keeps
    # bf16 sublane packing happy.
    TILE_B = min(512, _round_up(B, 16))
    Bp = _round_up(B, TILE_B)

    # Only the batch dim is padded; feature width D stays un-padded in HBM.
    feat_p = jnp.zeros((Bp, D), jnp.bfloat16).at[:B].set(feature.astype(jnp.bfloat16))
    dom_p = jnp.zeros((Bp, 1), jnp.int32).at[:B, 0].set(domain_ids.astype(jnp.int32))

    grid = (Bp // TILE_B,)
    kernel = functools.partial(_classifier_kernel,
                               num_domains=ND, hidden_pad=Hp)

    flops = int(2 * Bp * D * ND * Hp + 2 * Bp * ND * Hp * Cp)
    bytes_accessed = int(
        feat_p.size * 2 + dom_p.size * 4
        + params.w1c.size * 2 + params.b1c.size * 4
        + params.w2s.size * 2 + params.b2p.size * 4
        + Bp * Cp * 4)

    # Explicit VMEM budget: resident weights (x2 for the double-buffered
    # fallback) + double-buffered activation tiles + hidden intermediate.
    def _nbytes(a):
        return a.size * a.dtype.itemsize
    weight_bytes = sum(_nbytes(a) for a in
                       (params.w1c, params.b1c, params.w2s, params.b2p))
    act_bytes = 2 * (TILE_B * D * 2 + TILE_B * 4 + TILE_B * Cp * 4)
    inter_bytes = 2 * TILE_B * ND * Hp * 4
    vmem_limit = int(min(64 << 20,
                         max(32 << 20,
                             2 * weight_bytes + act_bytes + inter_bytes + (4 << 20))))

    def _invoke(single_buffer_weights):
        if single_buffer_weights:
            def wspec(shape):
                return pl.BlockSpec(shape, lambda i: (0, 0),
                                    pipeline_mode=pl.Buffered(1))
        else:
            def wspec(shape):
                return pl.BlockSpec(shape, lambda i: (0, 0))

        return pl.pallas_call(
            kernel,
            out_shape=jax.ShapeDtypeStruct((Bp, Cp), jnp.float32),
            grid=grid,
            in_specs=[
                pl.BlockSpec((TILE_B, D), lambda i: (i, 0)),   # features (bf16)
                pl.BlockSpec((TILE_B, 1), lambda i: (i, 0)),   # domain ids
                wspec((D, ND * Hp)),                           # W1 concat (resident)
                wspec((1, ND * Hp)),                           # b1 concat
                wspec((ND * Hp, Cp)),                          # W2 stacked
                wspec((ND, Cp)),                               # b2
            ],
            out_specs=pl.BlockSpec((TILE_B, Cp), lambda i: (i, 0)),
            compiler_params=pltpu.CompilerParams(
                dimension_semantics=("parallel",),
                vmem_limit_bytes=vmem_limit),
            cost_estimate=pl.CostEstimate(
                flops=flops, transcendentals=0, bytes_accessed=bytes_accessed),
        )(feat_p, dom_p, params.w1c, params.b1c, params.w2s, params.b2p)

    try:
        out = _invoke(True)
    except Exception:
        # pl.Buffered(1) single-buffering not supported by this JAX build;
        # fall back to default double-buffered weight blocks (correctness identical).
        out = _invoke(False)

    return out[:B, :C]


def _reference(feature, domain_ids, w1, b1, w2, b2):
    # Plain-JAX reference with the same bf16 operand rounding as the kernel.
    f = feature.astype(jnp.bfloat16).astype(jnp.float32)
    w1r = w1.astype(jnp.bfloat16).astype(jnp.float32)
    w2r = w2.astype(jnp.bfloat16).astype(jnp.float32)
    w1_sel = jnp.take(w1r, domain_ids, axis=0)   # [B, D, D]
    b1_sel = jnp.take(b1, domain_ids, axis=0)    # [B, D]
    w2_sel = jnp.take(w2r, domain_ids, axis=0)   # [B, D, 2]
    b2_sel = jnp.take(b2, domain_ids, axis=0)    # [B, 2]
    h = jnp.einsum("bd,bde->be", f, w1_sel,
                   precision=lax.Precision.HIGHEST) + b1_sel
    h = jnp.maximum(h, 0.0)
    h = h.astype(jnp.bfloat16).astype(jnp.float32)
    return jnp.einsum("bd,bde->be", h, w2_sel,
                      precision=lax.Precision.HIGHEST) + b2_sel


if __name__ == "__main__":
    B = 4
    D = 32            # d_model
    NUM_DOMAINS = 3

    key = jax.random.PRNGKey(0)
    k_feat, k_w1, k_b1, k_w2, k_b2 = jax.random.split(key, 5)

    feature = jax.random.normal(k_feat, (B, D), dtype=jnp.float32)
    domain_ids = jnp.array([0, 2, 1, 0], dtype=jnp.int32)

    # Deterministic synthetic parameters (per-domain Linear(D,D) and Linear(D,2)).
    w1 = jax.random.normal(k_w1, (NUM_DOMAINS, D, D), dtype=jnp.float32) * 0.05
    b1 = jax.random.normal(k_b1, (NUM_DOMAINS, D), dtype=jnp.float32) * 0.05
    w2 = jax.random.normal(k_w2, (NUM_DOMAINS, D, 2), dtype=jnp.float32) * 0.05
    b2 = jax.random.normal(k_b2, (NUM_DOMAINS, 2), dtype=jnp.float32) * 0.05

    params = prepare_classifier_params(w1, b1, w2, b2)   # one-time weight packing
    logits = fake_news_classifier(feature, domain_ids, params)
    logits = jax.block_until_ready(logits)

    expected = _reference(feature, domain_ids, w1, b1, w2, b2)
    assert logits.shape == (B, 2)
    assert jnp.allclose(logits, expected, atol=1e-3, rtol=1e-3), (
        f"mismatch:\n{logits}\nvs\n{expected}")

    print("KERNEL_OK")
</pallas_src>

<mosaic_0001>
module attributes {stable_mosaic.version = 11 : i64} {
  func.func @_classifier_kernel(%arg0: i32, %arg1: memref<16x32xbf16, #tpu.memory_space<vmem>>, %arg2: memref<16x1xi32, #tpu.memory_space<vmem>>, %arg3: memref<32x384xbf16, #tpu.memory_space<vmem>>, %arg4: memref<1x384xf32, #tpu.memory_space<vmem>>, %arg5: memref<384x128xbf16, #tpu.memory_space<vmem>>, %arg6: memref<3x128xf32, #tpu.memory_space<vmem>>, %arg7: memref<16x128xf32, #tpu.memory_space<vmem>>) attributes {dimension_semantics = [#tpu.dimension_semantics<parallel>], iteration_bounds = array<i64: 1>, scalar_prefetch = 0 : i64, scratch_operands = 0 : i64, tpu.core_type = #tpu.core_type<tc>, window_params = [{transform_indices = @transform_0, window_bounds = array<i64: 16, 32>}, {transform_indices = @transform_1, window_bounds = array<i64: 16, 1>}, {pipeline_mode = #tpu.pipeline_mode<synchronous>, transform_indices = @transform_2, window_bounds = array<i64: 32, 384>}, {pipeline_mode = #tpu.pipeline_mode<synchronous>, transform_indices = @transform_3, window_bounds = array<i64: 1, 384>}, {pipeline_mode = #tpu.pipeline_mode<synchronous>, transform_indices = @transform_4, window_bounds = array<i64: 384, 128>}, {pipeline_mode = #tpu.pipeline_mode<synchronous>, transform_indices = @transform_5, window_bounds = array<i64: 3, 128>}, {transform_indices = @transform_6, window_bounds = array<i64: 16, 128>}]} {
    %c0 = arith.constant 0 : index
    %c0_0 = arith.constant 0 : index
    %0 = vector.load %arg1[%c0, %c0_0] : memref<16x32xbf16, #tpu.memory_space<vmem>>, vector<16x32xbf16>
    %c0_1 = arith.constant 0 : index
    %c0_2 = arith.constant 0 : index
    %1 = vector.load %arg2[%c0_1, %c0_2] : memref<16x1xi32, #tpu.memory_space<vmem>>, vector<16x1xi32>
    %c0_3 = arith.constant 0 : index
    %c0_4 = arith.constant 0 : index
    %2 = vector.load %arg3[%c0_3, %c0_4] : memref<32x384xbf16, #tpu.memory_space<vmem>>, vector<32x384xbf16>
    %cst = arith.constant dense<0.000000e+00> : vector<16x384xf32>
    %3 = tpu.matmul %0, %2, %cst {dimension_numbers = #tpu.dot_dimension_numbers<[1], [0], [0], [1], [0, 0, 1, 1], [], []>} : vector<16x32xbf16>, vector<32x384xbf16>, vector<16x384xf32> -> vector<16x384xf32>
    %c0_5 = arith.constant 0 : index
    %c0_6 = arith.constant 0 : index
    %4 = vector.load %arg4[%c0_5, %c0_6] : memref<1x384xf32, #tpu.memory_space<vmem>>, vector<1x384xf32>
    %5 = vector.broadcast %4 : vector<1x384xf32> to vector<16x384xf32>
    %6 = arith.addf %3, %5 : vector<16x384xf32>
    %cst_7 = arith.constant 0.000000e+00 : f32
    %7 = vector.broadcast %cst_7 : f32 to vector<16x384xf32>
    %8 = arith.maximumf %6, %7 : vector<16x384xf32>
    %9 = tpu.iota {dimensions = array<i32: 1>} : vector<16x384xi32>
    %c128_i32 = arith.constant 128 : i32
    %10 = vector.broadcast %c128_i32 : i32 to vector<16x1xi32>
    %11 = arith.muli %1, %10 : vector<16x1xi32>
    %12 = vector.broadcast %11 : vector<16x1xi32> to vector<16x384xi32>
    %13 = arith.cmpi sge, %9, %12 : vector<16x384xi32>
    %c128_i32_8 = arith.constant 128 : i32
    %14 = vector.broadcast %c128_i32_8 : i32 to vector<16x1xi32>
    %15 = arith.addi %11, %14 : vector<16x1xi32>
    %16 = vector.broadcast %15 : vector<16x1xi32> to vector<16x384xi32>
    %17 = arith.cmpi slt, %9, %16 : vector<16x384xi32>
    %18 = arith.andi %13, %17 : vector<16x384xi1>
    %cst_9 = arith.constant 0.000000e+00 : f32
    %19 = vector.broadcast %cst_9 : f32 to vector<16x384xf32>
    %20 = arith.select %18, %8, %19 : vector<16x384xi1>, vector<16x384xf32>
    %21 = arith.truncf %20 : vector<16x384xf32> to vector<16x384xbf16>
    %c0_10 = arith.constant 0 : index
    %c0_11 = arith.constant 0 : index
    %22 = vector.load %arg5[%c0_10, %c0_11] : memref<384x128xbf16, #tpu.memory_space<vmem>>, vector<384x128xbf16>
    %cst_12 = arith.constant dense<0.000000e+00> : vector<16x128xf32>
    %23 = tpu.matmul %21, %22, %cst_12 {dimension_numbers = #tpu.dot_dimension_numbers<[1], [0], [0], [1], [0, 0, 1, 1], [], []>} : vector<16x384xbf16>, vector<384x128xbf16>, vector<16x128xf32> -> vector<16x128xf32>
    %c0_13 = arith.constant 0 : index
    %c0_14 = arith.constant 0 : index
    %24 = vector.load %arg6[%c0_13, %c0_14] : memref<3x128xf32, #tpu.memory_space<vmem>>, vector<3x128xf32>
    %cst_15 = arith.constant 0.000000e+00 : f32
    %25 = vector.broadcast %cst_15 : f32 to vector<16x128xf32>
    %c0_i32 = arith.constant 0 : i32
    %26 = vector.broadcast %c0_i32 : i32 to vector<16x1xi32>
    %27 = arith.cmpi eq, %1, %26 : vector<16x1xi32>
    %28 = vector.extract_strided_slice %24 {offsets = [0, 0], sizes = [1, 128], strides = [1, 1]} : vector<3x128xf32> to vector<1x128xf32>
    %29 = vector.shape_cast %27 : vector<16x1xi1> to vector<16x1xi1>
    %30 = vector.broadcast %29 : vector<16x1xi1> to vector<16x128xi1>
    %31 = vector.shape_cast %28 : vector<1x128xf32> to vector<1x128xf32>
    %32 = vector.broadcast %31 : vector<1x128xf32> to vector<16x128xf32>
    %33 = arith.select %30, %32, %25 : vector<16x128xi1>, vector<16x128xf32>
    %c1_i32 = arith.constant 1 : i32
    %34 = vector.broadcast %c1_i32 : i32 to vector<16x1xi32>
    %35 = arith.cmpi eq, %1, %34 : vector<16x1xi32>
    %36 = vector.extract_strided_slice %24 {offsets = [1, 0], sizes = [1, 128], strides = [1, 1]} : vector<3x128xf32> to vector<1x128xf32>
    %37 = vector.shape_cast %35 : vector<16x1xi1> to vector<16x1xi1>
    %38 = vector.broadcast %37 : vector<16x1xi1> to vector<16x128xi1>
    %39 = vector.shape_cast %36 : vector<1x128xf32> to vector<1x128xf32>
    %40 = vector.broadcast %39 : vector<1x128xf32> to vector<16x128xf32>
    %41 = arith.select %38, %40, %33 : vector<16x128xi1>, vector<16x128xf32>
    %c2_i32 = arith.constant 2 : i32
    %42 = vector.broadcast %c2_i32 : i32 to vector<16x1xi32>
    %43 = arith.cmpi eq, %1, %42 : vector<16x1xi32>
    %44 = vector.extract_strided_slice %24 {offsets = [2, 0], sizes = [1, 128], strides = [1, 1]} : vector<3x128xf32> to vector<1x128xf32>
    %45 = vector.shape_cast %43 : vector<16x1xi1> to vector<16x1xi1>
    %46 = vector.broadcast %45 : vector<16x1xi1> to vector<16x128xi1>
    %47 = vector.shape_cast %44 : vector<1x128xf32> to vector<1x128xf32>
    %48 = vector.broadcast %47 : vector<1x128xf32> to vector<16x128xf32>
    %49 = arith.select %46, %48, %41 : vector<16x128xi1>, vector<16x128xf32>
    %50 = arith.addf %23, %49 : vector<16x128xf32>
    %c0_16 = arith.constant 0 : index
    %c0_17 = arith.constant 0 : index
    %51 = vector.load %arg7[%c0_16, %c0_17] : memref<16x128xf32, #tpu.memory_space<vmem>>, vector<16x128xf32>
    tpu.vector_store %arg7[%c0_16, %c0_17], %50 {strides = array<i32>} : memref<16x128xf32, #tpu.memory_space<vmem>>, vector<16x128xf32>,
    return
  }
  func.func @transform_0(%arg0: i32) -> (i32, i32) {
    %c0_i32 = arith.constant 0 : i32
    %c0_i32_0 = arith.constant 0 : i32
    return %arg0, %c0_i32 : i32, i32
  }
  func.func @transform_1(%arg0: i32) -> (i32, i32) {
    %c0_i32 = arith.constant 0 : i32
    %c0_i32_0 = arith.constant 0 : i32
    return %arg0, %c0_i32 : i32, i32
  }
  func.func @transform_2(%arg0: i32) -> (i32, i32) {
    %c0_i32 = arith.constant 0 : i32
    %c0_i32_0 = arith.constant 0 : i32
    %c0_i32_1 = arith.constant 0 : i32
    return %c0_i32, %c0_i32_0 : i32, i32
  }
  func.func @transform_3(%arg0: i32) -> (i32, i32) {
    %c0_i32 = arith.constant 0 : i32
    %c0_i32_0 = arith.constant 0 : i32
    %c0_i32_1 = arith.constant 0 : i32
    return %c0_i32, %c0_i32_0 : i32, i32
  }
  func.func @transform_4(%arg0: i32) -> (i32, i32) {
    %c0_i32 = arith.constant 0 : i32
    %c0_i32_0 = arith.constant 0 : i32
    %c0_i32_1 = arith.constant 0 : i32
    return %c0_i32, %c0_i32_0 : i32, i32
  }
  func.func @transform_5(%arg0: i32) -> (i32, i32) {
    %c0_i32 = arith.constant 0 : i32
    %c0_i32_0 = arith.constant 0 : i32
    %c0_i32_1 = arith.constant 0 : i32
    return %c0_i32, %c0_i32_0 : i32, i32
  }
  func.func @transform_6(%arg0: i32) -> (i32, i32) {
    %c0_i32 = arith.constant 0 : i32
    %c0_i32_0 = arith.constant 0 : i32
    return %arg0, %c0_i32 : i32, i32
  }
}

module attributes {stable_mosaic.version = 11 : i64} {
  func.func @_classifier_kernel(%arg0: i32, %arg1: memref<16x32xbf16, #tpu.memory_space<vmem>>, %arg2: memref<16x1xi32, #tpu.memory_space<vmem>>, %arg3: memref<32x384xbf16, #tpu.memory_space<vmem>>, %arg4: memref<1x384xf32, #tpu.memory_space<vmem>>, %arg5: memref<384x128xbf16, #tpu.memory_space<vmem>>, %arg6: memref<3x128xf32, #tpu.memory_space<vmem>>, %arg7: memref<16x128xf32, #tpu.memory_space<vmem>>) attributes {dimension_semantics = [#tpu.dimension_semantics<parallel>], iteration_bounds = array<i64: 1>, scalar_prefetch = 0 : i64, scratch_operands = 0 : i64, tpu.core_type = #tpu.core_type<tc>, window_params = [{transform_indices = @transform_0, window_bounds = array<i64: 16, 32>}, {transform_indices = @transform_1, window_bounds = array<i64: 16, 1>}, {pipeline_mode = #tpu.pipeline_mode<synchronous>, transform_indices = @transform_2, window_bounds = array<i64: 32, 384>}, {pipeline_mode = #tpu.pipeline_mode<synchronous>, transform_indices = @transform_3, window_bounds = array<i64: 1, 384>}, {pipeline_mode = #tpu.pipeline_mode<synchronous>, transform_indices = @transform_4, window_bounds = array<i64: 384, 128>}, {pipeline_mode = #tpu.pipeline_mode<synchronous>, transform_indices = @transform_5, window_bounds = array<i64: 3, 128>}, {transform_indices = @transform_6, window_bounds = array<i64: 16, 128>}]} {
    %c0 = arith.constant 0 : index
    %c0_0 = arith.constant 0 : index
    %0 = vector.load %arg1[%c0, %c0_0] : memref<16x32xbf16, #tpu.memory_space<vmem>>, vector<16x32xbf16>
    %c0_1 = arith.constant 0 : index
    %c0_2 = arith.constant 0 : index
    %1 = vector.load %arg2[%c0_1, %c0_2] : memref<16x1xi32, #tpu.memory_space<vmem>>, vector<16x1xi32>
    %c0_3 = arith.constant 0 : index
    %c0_4 = arith.constant 0 : index
    %2 = vector.load %arg3[%c0_3, %c0_4] : memref<32x384xbf16, #tpu.memory_space<vmem>>, vector<32x384xbf16>
    %cst = arith.constant dense<0.000000e+00> : vector<16x384xf32>
    %3 = tpu.matmul %0, %2, %cst {dimension_numbers = #tpu.dot_dimension_numbers<[1], [0], [0], [1], [0, 0, 1, 1], [], []>} : vector<16x32xbf16>, vector<32x384xbf16>, vector<16x384xf32> -> vector<16x384xf32>
    %c0_5 = arith.constant 0 : index
    %c0_6 = arith.constant 0 : index
    %4 = vector.load %arg4[%c0_5, %c0_6] : memref<1x384xf32, #tpu.memory_space<vmem>>, vector<1x384xf32>
    %5 = vector.broadcast %4 : vector<1x384xf32> to vector<16x384xf32>
    %6 = arith.addf %3, %5 : vector<16x384xf32>
    %cst_7 = arith.constant 0.000000e+00 : f32
    %7 = vector.broadcast %cst_7 : f32 to vector<16x384xf32>
    %8 = arith.maximumf %6, %7 : vector<16x384xf32>
    %9 = tpu.iota {dimensions = array<i32: 1>} : vector<16x384xi32>
    %c128_i32 = arith.constant 128 : i32
    %10 = vector.broadcast %c128_i32 : i32 to vector<16x1xi32>
    %11 = arith.muli %1, %10 : vector<16x1xi32>
    %12 = vector.broadcast %11 : vector<16x1xi32> to vector<16x384xi32>
    %13 = arith.cmpi sge, %9, %12 : vector<16x384xi32>
    %c128_i32_8 = arith.constant 128 : i32
    %14 = vector.broadcast %c128_i32_8 : i32 to vector<16x1xi32>
    %15 = arith.addi %11, %14 : vector<16x1xi32>
    %16 = vector.broadcast %15 : vector<16x1xi32> to vector<16x384xi32>
    %17 = arith.cmpi slt, %9, %16 : vector<16x384xi32>
    %18 = arith.andi %13, %17 : vector<16x384xi1>
    %cst_9 = arith.constant 0.000000e+00 : f32
    %19 = vector.broadcast %cst_9 : f32 to vector<16x384xf32>
    %20 = arith.select %18, %8, %19 : vector<16x384xi1>, vector<16x384xf32>
    %21 = arith.truncf %20 : vector<16x384xf32> to vector<16x384xbf16>
    %c0_10 = arith.constant 0 : index
    %c0_11 = arith.constant 0 : index
    %22 = vector.load %arg5[%c0_10, %c0_11] : memref<384x128xbf16, #tpu.memory_space<vmem>>, vector<384x128xbf16>
    %cst_12 = arith.constant dense<0.000000e+00> : vector<16x128xf32>
    %23 = tpu.matmul %21, %22, %cst_12 {dimension_numbers = #tpu.dot_dimension_numbers<[1], [0], [0], [1], [0, 0, 1, 1], [], []>} : vector<16x384xbf16>, vector<384x128xbf16>, vector<16x128xf32> -> vector<16x128xf32>
    %c0_13 = arith.constant 0 : index
    %c0_14 = arith.constant 0 : index
    %24 = vector.load %arg6[%c0_13, %c0_14] : memref<3x128xf32, #tpu.memory_space<vmem>>, vector<3x128xf32>
    %cst_15 = arith.constant 0.000000e+00 : f32
    %25 = vector.broadcast %cst_15 : f32 to vector<16x128xf32>
    %c0_i32 = arith.constant 0 : i32
    %26 = vector.broadcast %c0_i32 : i32 to vector<16x1xi32>
    %27 = arith.cmpi eq, %1, %26 : vector<16x1xi32>
    %28 = vector.extract_strided_slice %24 {offsets = [0, 0], sizes = [1, 128], strides = [1, 1]} : vector<3x128xf32> to vector<1x128xf32>
    %29 = vector.shape_cast %27 : vector<16x1xi1> to vector<16x1xi1>
    %30 = vector.broadcast %29 : vector<16x1xi1> to vector<16x128xi1>
    %31 = vector.shape_cast %28 : vector<1x128xf32> to vector<1x128xf32>
    %32 = vector.broadcast %31 : vector<1x128xf32> to vector<16x128xf32>
    %33 = arith.select %30, %32, %25 : vector<16x128xi1>, vector<16x128xf32>
    %c1_i32 = arith.constant 1 : i32
    %34 = vector.broadcast %c1_i32 : i32 to vector<16x1xi32>
    %35 = arith.cmpi eq, %1, %34 : vector<16x1xi32>
    %36 = vector.extract_strided_slice %24 {offsets = [1, 0], sizes = [1, 128], strides = [1, 1]} : vector<3x128xf32> to vector<1x128xf32>
    %37 = vector.shape_cast %35 : vector<16x1xi1> to vector<16x1xi1>
    %38 = vector.broadcast %37 : vector<16x1xi1> to vector<16x128xi1>
    %39 = vector.shape_cast %36 : vector<1x128xf32> to vector<1x128xf32>
    %40 = vector.broadcast %39 : vector<1x128xf32> to vector<16x128xf32>
    %41 = arith.select %38, %40, %33 : vector<16x128xi1>, vector<16x128xf32>
    %c2_i32 = arith.constant 2 : i32
    %42 = vector.broadcast %c2_i32 : i32 to vector<16x1xi32>
    %43 = arith.cmpi eq, %1, %42 : vector<16x1xi32>
    %44 = vector.extract_strided_slice %24 {offsets = [2, 0], sizes = [1, 128], strides = [1, 1]} : vector<3x128xf32> to vector<1x128xf32>
    %45 = vector.shape_cast %43 : vector<16x1xi1> to vector<16x1xi1>
    %46 = vector.broadcast %45 : vector<16x1xi1> to vector<16x128xi1>
    %47 = vector.shape_cast %44 : vector<1x128xf32> to vector<1x128xf32>
    %48 = vector.broadcast %47 : vector<1x128xf32> to vector<16x128xf32>
    %49 = arith.select %46, %48, %41 : vector<16x128xi1>, vector<16x128xf32>
    %50 = arith.addf %23, %49 : vector<16x128xf32>
    %c0_16 = arith.constant 0 : index
    %c0_17 = arith.constant 0 : index
    %51 = vector.load %arg7[%c0_16, %c0_17] : memref<16x128xf32, #tpu.memory_space<vmem>>, vector<16x128xf32>
    tpu.vector_store %arg7[%c0_16, %c0_17], %50 {strides = array<i32>} : memref<16x128xf32, #tpu.memory_space<vmem>>, vector<16x128xf32>,
    return
  }
  func.func @transform_0(%arg0: i32) -> (i32, i32) {
    %c0_i32 = arith.constant 0 : i32
    %c0_i32_0 = arith.constant 0 : i32
    return %arg0, %c0_i32 : i32, i32
  }
  func.func @transform_1(%arg0: i32) -> (i32, i32) {
    %c0_i32 = arith.constant 0 : i32
    %c0_i32_0 = arith.constant 0 : i32
    return %arg0, %c0_i32 : i32, i32
  }
  func.func @transform_2(%arg0: i32) -> (i32, i32) {
    %c0_i32 = arith.constant 0 : i32
    %c0_i32_0 = arith.constant 0 : i32
    %c0_i32_1 = arith.constant 0 : i32
    return %c0_i32, %c0_i32_0 : i32, i32
  }
  func.func @transform_3(%arg0: i32) -> (i32, i32) {
    %c0_i32 = arith.constant 0 : i32
    %c0_i32_0 = arith.constant 0 : i32
    %c0_i32_1 = arith.constant 0 : i32
    return %c0_i32, %c0_i32_0 : i32, i32
  }
  func.func @transform_4(%arg0: i32) -> (i32, i32) {
    %c0_i32 = arith.constant 0 : i32
    %c0_i32_0 = arith.constant 0 : i32
    %c0_i32_1 = arith.constant 0 : i32
    return %c0_i32, %c0_i32_0 : i32, i32
  }
  func.func @transform_5(%arg0: i32) -> (i32, i32) {
    %c0_i32 = arith.constant 0 : i32
    %c0_i32_0 = arith.constant 0 : i32
    %c0_i32_1 = arith.constant 0 : i32
    return %c0_i32, %c0_i32_0 : i32, i32
  }
  func.func @transform_6(%arg0: i32) -> (i32, i32) {
    %c0_i32 = arith.constant 0 : i32
    %c0_i32_0 = arith.constant 0 : i32
    return %arg0, %c0_i32 : i32, i32
  }
}

</mosaic_0001>

<bundles_post_ra>
// kernel: tpu_custom_call.1
= control target key start
LH: loop header
LB: loop body
LE: loop exit
PB: predicated region body
PF: predicated region fallthrough
CT: control target
= control target key end

     0   :  { %11 = vsyncpa [#allocation3], 0  ;;  %s854_s0 = inlined_call_operand.vmem [shape: bf16[16,32], index: 0, kind: input, shape index: {}]   ;;  %s855_s1 = inlined_call_operand.vmem [shape: s32[16,1], index: 1, kind: input, shape index: {}]   ;;  %s856_s2 = inlined_call_operand.hbm [shape: bf16[32,384], index: 2, kind: input, shape index: {}]   ;;  %s857_s3 = inlined_call_operand.vmem [shape: f32[1,384], index: 3, kind: input, shape index: {}]   ;;  %s858_s4 = inlined_call_operand.hbm [shape: bf16[384,128], index: 4, kind: input, shape index: {}]   ;;  %s859_s5 = inlined_call_operand.vmem [shape: f32[3,128], index: 5, kind: input, shape index: {}]   ;;  %s860_s6 = inlined_call_operand.hbm [shape: f32[16,128], index: 6, kind: output, shape index: {}]  }
   0x1   :  { %12 = vsyncpa [#allocation6], 0 }
   0x2   :  { %13 = vsyncpa [#allocation4], 0  ;;  %s22_s23 = sshll.u32 %s856_s2, 4  ;;  %s773_s24 = smov [#allocation2]   ;;  %s23_s23 = int_to_ptr.hbm [resolvable:$true] %s22_s23 }
   0x3   :  { %s24_s25 = sshll.u32 %s773_s24, 4  ;;  %s37_s28 = sshll.u32 %s858_s4, 4  ;;  %s25_s25 = int_to_ptr.vmem [resolvable:$true] %s24_s25  ;;  %s38_s28 = int_to_ptr.hbm [resolvable:$true] %s37_s28 }
   0x4   :  { %s774_s29 = smov 192   ;;  %s775_s30 = smov 12  }
   0x5   :  { %30 = dma.hbm_to_vmem [thread:$0]  %s23_s23, 768, %s25_s25, [#allocation3], %s774_s29, %s774_s29, %s775_s30  }
   0x6   :  { %s776_s7 = smov [#allocation5]   ;;  %s777_s9 = smov 64  }
   0x7   :  { %s39_s8 = sshll.u32 %s776_s7, 4  ;;  %s778_s10 = smov 4   ;;  %s40_s8 = int_to_ptr.vmem [resolvable:$true] %s39_s8 }
   0x8   :  { %45 = dma.hbm_to_vmem [thread:$0]  %s38_s28, 3072, %s40_s8, [#allocation6], %s777_s9, %s777_s9, %s778_s10  }
   0x9   :  { %767 = dma.done.wait [#allocation3], 768  }
   0xa   :  { %768 = vsyncadd [#allocation3], 4294966528 }
   0xb   :  { %769 = dma.done.wait [#allocation6], 3072  }
   0xc   :  { %770 = vsyncadd [#allocation6], 4294964224  ;;  %v779_v0 = vmov 0   ;;  %v533_v1 = vld [vmem:[#allocation2 + $0x18] sm:$0xf]  ;;  %v59_v14 = vld [vmem:[%s855_s1] sm:$0xff]  ;;  %v166_v54 = vlaneseq }
   0xd   :  { %692 = vset.pattern.permute.xlu0 %v779_v0  ;;  %693 = vset.pattern.permute.xlu1 %v779_v0  ;;  %v656_v2 = vld [vmem:[#allocation2 + $0x20] sm:$0xf0]  ;;  %v655_v3 = vld [vmem:[#allocation2 + $0x1c] sm:$0xf]  ;;  %v535_v5 = vld [vmem:[#allocation2 + $0x24] sm:$0xf0] }
   0xe   :  { %694 = vset.pattern.permute.xlu2 %v779_v0  ;;  %v534_v4 = vor.u32 %v656_v2, %v533_v1  ;;  %v521_v6 = vld [vmem:[#allocation2] sm:$0xf]  ;;  %v653_v7 = vld [vmem:[#allocation2 + $0x8] sm:$0xf0]  ;;  %v538_v8 = vor.u32 %v655_v3, %v535_v5  ;;  %v652_v9 = vld [vmem:[#allocation2 + $0x4] sm:$0xf] }
   0xf   :  { %v523_v10 = vld [vmem:[#allocation2 + $0xc] sm:$0xf0]  ;;  %v522_v11 = vor.u32 %v653_v7, %v521_v6  ;;  %v541_v12 = vld [vmem:[#allocation2 + $0x20] sm:$0xf]  ;;  %v657_v13 = vld [vmem:[#allocation2 + $0x28] sm:$0xf0] }
  0x10   :  { %124 = vmatpush.bf16.msra.mxu2 %v534_v4  ;;  %138 = vmatpush.bf16.msra.mxu1 %v538_v8  ;;  %v526_v15 = vor.u32 %v652_v9, %v523_v10  ;;  %v542_v16 = vor.u32 %v657_v13, %v541_v12  ;;  %v170_v17 = vmul.u32 128, %v59_v14  ;;  %v529_v18 = vld [vmem:[#allocation2 + $0x8] sm:$0xf]  ;;  %v654_v19 = vld [vmem:[#allocation2 + $0x10] sm:$0xf0]  ;;  %v651_v21 = vld [vmem:[%s854_s0] sm:$0xff] }
  0x11   :  { %v673_v20 = vld [vmem:[#allocation5 + $0x78] sm:$0xff]  ;;  %vm114_vm0 = vcmask 261120   ;;  %vm262_vm1 = vcmp.eq.s32.totalorder %v59_v14, 0  ;;  %v672_v25 = vld [vmem:[#allocation5 + $0x70] sm:$0xff]  ;;  %v530_v26 = vor.u32 %v654_v19, %v529_v18  ;;  %vm277_vm3 = vcmp.eq.s32.totalorder %v59_v14, 1  ;;  %v671_v35 = vld [vmem:[#allocation5 + $0x68] sm:$0xff] }
  0x12   :  { %173 = vperm.xlu0 %692, %v170_v17   ;;  %v184_v22 = vadd.s32 128, %v170_v17  ;;  %v665_v23 = vld [vmem:[#allocation5 + $0x38] sm:$0xff]  ;;  %465 = vmatpush.bf16.msra.mxu0 %v673_v20  ;;  %v264_v27 = vsel %vm262_vm1, 1, %v779_v0  ;;  %v279_v31 = vsel %vm277_vm3, 1, %v779_v0  ;;  %vm292_vm5 = vcmp.eq.s32.totalorder %v59_v14, 2  ;;  %v664_v36 = vld [vmem:[#allocation5 + $0x30] sm:$0xff] }
  0x13   :  { %v60_v24 = vld [vmem:[%s855_s1 + $0x8] sm:$0xff]  ;;  %267 = vperm.xlu2 %694, %v264_v27   ;;  %451 = vmatpush.bf16.msra.mxu3 %v665_v23  ;;  %v294_v33 = vsel %vm292_vm5, 1, %v779_v0  ;;  %v670_v37 = vld [vmem:[#allocation5 + $0x60] sm:$0xff]  ;;  %v663_v38 = vld [vmem:[#allocation5 + $0x28] sm:$0xff]  ;;  %v167_v58 = vand.u32 127, %v166_v54  ;;  %s501_s19 = sshll.u32 %s860_s6, 4  ;;  %s502_s19 = int_to_ptr.hbm [resolvable:$true] %s501_s19 }
  0x14   :  { %125 = vmatpush.bf16.msra.mxu2 %v522_v11  ;;  %139 = vmatpush.bf16.msra.mxu1 %v526_v15  ;;  %v171_v28 = vmul.u32 128, %v60_v24  ;;  %vm263_vm2 = vcmp.eq.s32.totalorder %v60_v24, 0  ;;  %vm278_vm4 = vcmp.eq.s32.totalorder %v60_v24, 1  ;;  %vm293_vm6 = vcmp.eq.s32.totalorder %v60_v24, 2  ;;  %v669_v39 = vld [vmem:[#allocation5 + $0x58] sm:$0xff]  ;;  %v662_v40 = vld [vmem:[#allocation5 + $0x20] sm:$0xff] }
  0x15   :  { %187 = vperm.xlu1 %693, %v184_v22   ;;  %v265_v30 = vsel %vm263_vm2, 1, %v779_v0  ;;  %v280_v32 = vsel %vm278_vm4, 1, %v779_v0  ;;  %v295_v34 = vsel %vm293_vm6, 1, %v779_v0  ;;  %v668_v41 = vld [vmem:[#allocation5 + $0x50] sm:$0xff]  ;;  %v661_v42 = vld [vmem:[#allocation5 + $0x18] sm:$0xff]  ;;  %v667_v44 = vld [vmem:[#allocation5 + $0x48] sm:$0xff] }
  0x16   :  { %466 = vmatpush.bf16.msra.mxu0 %v672_v25  ;;  %v185_v29 = vadd.s32 128, %v171_v28  ;;  %v681_v43 = vld [vmem:[#allocation5 + $0xb8] sm:$0xff]  ;;  %v660_v45 = vld [vmem:[#allocation5 + $0x10] sm:$0xff]  ;;  %v666_v47 = vld [vmem:[#allocation5 + $0x40] sm:$0xff]  ;;  %v168_v62 = vadd.s32 128, %v167_v58  ;;  %v169_v17 = vadd.s32 256, %v167_v58 }
  0x17   :  { %543 = vmatmul.msk.bf16.vlgmr.msra.gmra.mxu2 %vm114_vm0, %v651_v21  ;;  %544 = vmatmul.msk.bf16.vlgmr.msra.gmra.mxu1 %vm114_vm0, %v651_v21  ;;  %v680_v46 = vld [vmem:[#allocation5 + $0xb0] sm:$0xff]  ;;  %v659_v48 = vld [vmem:[#allocation5 + $0x8] sm:$0xff]  ;;  %v658_v50 = vld [vmem:[#allocation5] sm:$0xff]  ;;  %s781_s20 = smov 128   ;;  %s782_s21 = smov 8  }
  0x18   :  { %152 = vmatpush.bf16.msrb.mxu2 %v542_v16  ;;  %452 = vmatpush.bf16.msra.mxu3 %v664_v36  ;;  %v679_v49 = vld [vmem:[#allocation5 + $0xa8] sm:$0xff]  ;;  %v678_v51 = vld [vmem:[#allocation5 + $0xa0] sm:$0xff]  ;;  %v677_v52 = vld [vmem:[#allocation5 + $0x98] sm:$0xff] }
  0x19   :  { %479 = vmatpush.bf16.msrb.mxu1 %v681_v43  ;;  %v676_v53 = vld [vmem:[#allocation5 + $0x90] sm:$0xff]  ;;  %v675_v57 = vld [vmem:[#allocation5 + $0x88] sm:$0xff]  ;;  %v674_v61 = vld [vmem:[#allocation5 + $0x80] sm:$0xff] }
  0x1a   :  { %176 = vperm.xlu0 %692, %v171_v28   ;;  %467 = vmatpush.bf16.msra.mxu0 %v671_v35  ;;  %v69_v59 = vld [vmem:[%s857_s3] sm:$0x7] }
  0x1b   :  { %270 = vperm.xlu2 %694, %v265_v30   ;;  %v72_v63 = vperm.slane %v69_v59, 1  ;;  %v71_v4 = vperm.slane %v69_v59, 0  ;;  %v73_v18 = vperm.slane %v69_v59, 2  ;;  %v261_v27 = vld [vmem:[%s859_s5] sm:$0x7]  ;;  %s780_s5 = smov [#allocation7]  }
  0x1c   :  { %153 = vmatpush.bf16.msrb.mxu2 %v530_v26  ;;  %453 = vmatpush.bf16.msra.mxu3 %v663_v38  ;;  %v274_v28 = vperm.slane %v261_v27, 0  ;;  %v289_v30 = vperm.slane %v261_v27, 1  ;;  %s499_s16 = sshll.u32 %s780_s5, 4  ;;  %s500_s16 = int_to_ptr.vmem [resolvable:$true] %s499_s16 }
  0x1d   :  { %190 = vperm.xlu1 %693, %v185_v29   ;;  %480 = vmatpush.bf16.msrb.mxu1 %v680_v46 }
  0x1e   :  { %468 = vmatpush.bf16.msra.mxu0 %v670_v37 }
  0x20   :  { %454 = vmatpush.bf16.msra.mxu3 %v662_v40 }
  0x21   :  { %481 = vmatpush.bf16.msrb.mxu1 %v679_v49 }
  0x22   :  { %282 = vperm.xlu0 %692, %v279_v31   ;;  %469 = vmatpush.bf16.msra.mxu0 %v669_v39 }
  0x23   :  { %297 = vperm.xlu2 %694, %v294_v33   ;;  %v304_v33 = vperm.slane %v261_v27, 2 }
  0x24   :  { %455 = vmatpush.bf16.msra.mxu3 %v661_v42 }
  0x25   :  { %285 = vperm.xlu1 %693, %v280_v32   ;;  %482 = vmatpush.bf16.msrb.mxu1 %v678_v51 }
  0x26   :  { %470 = vmatpush.bf16.msra.mxu0 %v668_v41 }
  0x27   :  { %545 = vmatmul.msk.bf16.vlgmr.msrb.gmra.mxu2 %vm114_vm0, %v651_v21 }
  0x28   :  { %456 = vmatpush.bf16.msra.mxu3 %v660_v45 }
  0x29   :  { %483 = vmatpush.bf16.msrb.mxu1 %v677_v52 }
  0x2a   :  { %300 = vperm.xlu0 %692, %v295_v34   ;;  %471 = vmatpush.bf16.msra.mxu0 %v667_v44 }
  0x2c   :  { %457 = vmatpush.bf16.msra.mxu3 %v659_v48 }
  0x2d   :  { %484 = vmatpush.bf16.msrb.mxu1 %v676_v53 }
  0x2e   :  { %472 = vmatpush.bf16.msra.mxu0 %v666_v47 }
  0x30   :  { %458 = vmatpush.bf16.msra.mxu3 %v658_v50 }
  0x31   :  { %485 = vmatpush.bf16.msrb.mxu1 %v675_v57 }
  0x35   :  { %486 = vmatpush.bf16.msrb.mxu1 %v674_v61 }
  0x6d   :  { %v268_v25 = vpop.permute.xlu2 %267 }
  0x75   :  { %v271_v26 = vpop.permute.xlu2 %270 }
  0x7d   :  { %v298_v32 = vpop.permute.xlu2 %297 }
  0x84   :  { %v174_v55 = vpop.permute.xlu0 %173 }
  0x85   :  { %vm179_vm7 = vcmp.ge.s32.totalorder %v168_v62, %v174_v55  ;;  %vm178_vm13 = vcmp.ge.s32.totalorder %v167_v58, %v174_v55  ;;  %vm180_vm5 = vcmp.ge.s32.totalorder %v169_v17, %v174_v55 }
  0x87   :  { %v188_v56 = vpop.permute.xlu1 %187 }
  0x88   :  { %vm193_vm8 = vcmp.lt.s32.totalorder %v168_v62, %v188_v56  ;;  %vm192_vm14 = vcmp.lt.s32.totalorder %v167_v58, %v188_v56  ;;  %vm194_vm6 = vcmp.lt.s32.totalorder %v169_v17, %v188_v56 }
  0x89   :  { %vm199_vm11 = vmand %vm179_vm7, %vm193_vm8 }
  0x8a   :  { %vm198_vm2 = vmand %vm178_vm13, %vm192_vm14  ;;  %vm302_vm14 = vcmp.eq.s32.totalorder %v298_v32, 1 }
  0x8c   :  { %v177_v0 = vpop.permute.xlu0 %176 }
  0x8d   :  { %vm182_vm9 = vcmp.ge.s32.totalorder %v168_v62, %v177_v0  ;;  %vm181_vm0 = vcmp.ge.s32.totalorder %v167_v58, %v177_v0  ;;  %vm183_vm7 = vcmp.ge.s32.totalorder %v169_v17, %v177_v0 }
  0x8f   :  { %v191_v2 = vpop.permute.xlu1 %190 }
  0x90   :  { %vm196_vm10 = vcmp.lt.s32.totalorder %v168_v62, %v191_v2  ;;  %vm195_vm1 = vcmp.lt.s32.totalorder %v167_v58, %v191_v2  ;;  %vm197_vm8 = vcmp.lt.s32.totalorder %v169_v17, %v191_v2 }
  0x91   :  { %vm202_vm12 = vmand %vm182_vm9, %vm196_vm10 }
  0x92   :  { %vm645_vm15 = vmpackc.low %vm202_vm12, %vm199_vm11  ;;  %vm272_vm12 = vcmp.eq.s32.totalorder %v268_v25, 1 }
  0x93   :  { %vm201_vm3 = vmand %vm181_vm0, %vm195_vm1  ;;  %v275_v31 = vsel %vm272_vm12, %v274_v28, 0.0 }
  0x94   :  { %v141_v60 = vpop.f32.mrf.mxu1  ;;  %vm642_vm4 = vmpackc.low %vm201_vm3, %vm198_vm2  ;;  %v283_v29 = vpop.permute.xlu0 %282 }
  0x95   :  { %v142_v1 = vadd.f32 %v141_v60, %v72_v63  ;;  %vm200_vm9 = vmand %vm180_vm5, %vm194_vm6  ;;  %vm287_vm13 = vcmp.eq.s32.totalorder %v283_v29, 1 }
  0x96   :  { %vm203_vm10 = vmand %vm183_vm7, %vm197_vm8  ;;  %v290_v35 = vsel %vm287_vm13, %v289_v30, %v275_v31 }
  0x97   :  { %v161_v6 = vmax.f32 %v142_v1, 0.0  ;;  %vm648_vm11 = vmpackc.low %vm203_vm10, %vm200_vm9  ;;  %v286_v36 = vpop.permute.xlu1 %285  ;;  %v305_v37 = vsel %vm302_vm14, %v304_v33, %v290_v35 }
  0x98   :  { %vm288_vm0 = vcmp.eq.s32.totalorder %v286_v36, 1 }
  0x9a   :  { %v127_v3 = vpop.f32.mrf.mxu2 }
  0x9b   :  { %v128_v9 = vadd.f32 %v127_v3, %v71_v4 }
  0x9c   :  { %v143_v5 = vpop.f32.mrf.mxu1  ;;  %v301_v40 = vpop.permute.xlu0 %300 }
  0x9d   :  { %v144_v7 = vadd.f32 %v143_v5, %v72_v63  ;;  %v160_v13 = vmax.f32 %v128_v9, 0.0  ;;  %vm303_vm1 = vcmp.eq.s32.totalorder %v301_v40, 1 }
  0x9f   :  { %v164_v8 = vmax.f32 %v144_v7, 0.0 }
  0xa1   :  { %v646_v10 = vpack.c.bf16 %v164_v8, %v161_v6 }
  0xa2   :  { %v129_v11 = vpop.f32.mrf.mxu2 }
  0xa3   :  { %v130_v12 = vadd.f32 %v129_v11, %v71_v4  ;;  %647 = vmatmul.msk.bf16.vlgmr.msra.gmra.mxu0 %vm645_vm15, %v646_v10  ;;  %vm273_vm15 = vcmp.eq.s32.totalorder %v271_v26, 1 }
  0xa4   :  { %v276_v39 = vsel %vm273_vm15, %v274_v28, 0.0 }
  0xa5   :  { %v163_v14 = vmax.f32 %v130_v12, 0.0  ;;  %v291_v42 = vsel %vm288_vm0, %v289_v30, %v276_v39 }
  0xa6   :  { %v306_v47 = vsel %vm303_vm1, %v304_v33, %v291_v42 }
  0xa7   :  { %v643_v15 = vpack.c.bf16 %v163_v14, %v160_v13 }
  0xa9   :  { %644 = vmatmul.msk.bf16.vlgmr.msra.gmra.mxu3 %vm642_vm4, %v643_v15 }
  0xaa   :  { %v155_v16 = vpop.f32.mrf.mxu2 }
  0xab   :  { %v156_v19 = vadd.f32 %v155_v16, %v73_v18 }
  0xad   :  { %v162_v22 = vmax.f32 %v156_v19, 0.0 }
  0xb2   :  { %v157_v20 = vpop.f32.mrf.mxu2 }
  0xb3   :  { %v158_v21 = vadd.f32 %v157_v20, %v73_v18 }
  0xb5   :  { %v165_v23 = vmax.f32 %v158_v21, 0.0 }
  0xb7   :  { %v649_v24 = vpack.c.bf16 %v165_v23, %v162_v22 }
  0xb9   :  { %650 = vmatmul.msk.bf16.vlgmr.msrb.gmra.mxu1 %vm648_vm11, %v649_v24 }
 0x120   :  { %v474_v41 = vpop.f32.mrf.mxu0 }
 0x128   :  { %v476_v49 = vpop.f32.mrf.mxu0 }
 0x12c   :  { %v460_v34 = vpop.f32.mrf.mxu3 }
 0x12d   :  { %v461_v38 = vadd.f32 %v460_v34, %v305_v37 }
 0x12f   :  { %v475_v43 = vadd.f32 %v474_v41, %v461_v38 }
 0x134   :  { %v462_v44 = vpop.f32.mrf.mxu3 }
 0x135   :  { %v463_v48 = vadd.f32 %v462_v44, %v306_v47 }
 0x136   :  { %v488_v45 = vpop.f32.mrf.mxu1 }
 0x137   :  { %v489_v46 = vadd.f32 %v488_v45, %v475_v43  ;;  %v477_v50 = vadd.f32 %v476_v49, %v463_v48 }
 0x139   :  { %493 = vst [vmem:[#allocation7] sm:$0xff] %v489_v46 }
 0x13e   :  { %v490_v51 = vpop.f32.mrf.mxu1 }
 0x13f   :  { %v491_v52 = vadd.f32 %v490_v51, %v477_v50 }
 0x141   :  { %494 = vst [vmem:[#allocation7 + $0x8] sm:$0xff] %v491_v52 }
 0x142   :  { %507 = dma.vmem_to_hbm [thread:$0]  %s500_s16, 256, %s502_s19, [#allocation4], %s781_s20, %s781_s20, %s782_s21  }
 0x143   :  { %771 = dma.done.wait [#allocation4], 256  }
 0x144   :  { %772 = vsyncadd [#allocation4], 4294967040 }
 0x145   :  { %512 = vsyncpa [#allocation3], 1 }
 0x146   :  { %513 = vsyncpa [#allocation6], 1 }
 0x147   :  { %514 = vsyncpa [#allocation4], 1 }

// kernel: tpu_custom_call.1
= control target key start
LH: loop header
LB: loop body
LE: loop exit
PB: predicated region body
PF: predicated region fallthrough
CT: control target
= control target key end

     0   :  { %11 = vsyncpa [#allocation3], 0  ;;  %s854_s0 = inlined_call_operand.vmem [shape: bf16[16,32], index: 0, kind: input, shape index: {}]   ;;  %s855_s1 = inlined_call_operand.vmem [shape: s32[16,1], index: 1, kind: input, shape index: {}]   ;;  %s856_s2 = inlined_call_operand.hbm [shape: bf16[32,384], index: 2, kind: input, shape index: {}]   ;;  %s857_s3 = inlined_call_operand.vmem [shape: f32[1,384], index: 3, kind: input, shape index: {}]   ;;  %s858_s4 = inlined_call_operand.hbm [shape: bf16[384,128], index: 4, kind: input, shape index: {}]   ;;  %s859_s5 = inlined_call_operand.vmem [shape: f32[3,128], index: 5, kind: input, shape index: {}]   ;;  %s860_s6 = inlined_call_operand.hbm [shape: f32[16,128], index: 6, kind: output, shape index: {}]  }
   0x1   :  { %12 = vsyncpa [#allocation6], 0 }
   0x2   :  { %13 = vsyncpa [#allocation4], 0  ;;  %s22_s23 = sshll.u32 %s856_s2, 4  ;;  %s773_s24 = smov [#allocation2]   ;;  %s23_s23 = int_to_ptr.hbm [resolvable:$true] %s22_s23 }
   0x3   :  { %s24_s25 = sshll.u32 %s773_s24, 4  ;;  %s37_s28 = sshll.u32 %s858_s4, 4  ;;  %s25_s25 = int_to_ptr.vmem [resolvable:$true] %s24_s25  ;;  %s38_s28 = int_to_ptr.hbm [resolvable:$true] %s37_s28 }
   0x4   :  { %s774_s29 = smov 192   ;;  %s775_s30 = smov 12  }
   0x5   :  { %30 = dma.hbm_to_vmem [thread:$0]  %s23_s23, 768, %s25_s25, [#allocation3], %s774_s29, %s774_s29, %s775_s30  }
   0x6   :  { %s776_s7 = smov [#allocation5]   ;;  %s777_s9 = smov 64  }
   0x7   :  { %s39_s8 = sshll.u32 %s776_s7, 4  ;;  %s778_s10 = smov 4   ;;  %s40_s8 = int_to_ptr.vmem [resolvable:$true] %s39_s8 }
   0x8   :  { %45 = dma.hbm_to_vmem [thread:$0]  %s38_s28, 3072, %s40_s8, [#allocation6], %s777_s9, %s777_s9, %s778_s10  }
   0x9   :  { %767 = dma.done.wait [#allocation3], 768  }
   0xa   :  { %768 = vsyncadd [#allocation3], 4294966528 }
   0xb   :  { %769 = dma.done.wait [#allocation6], 3072  }
   0xc   :  { %770 = vsyncadd [#allocation6], 4294964224  ;;  %v779_v0 = vmov 0   ;;  %v533_v1 = vld [vmem:[#allocation2 + $0x18] sm:$0xf]  ;;  %v59_v14 = vld [vmem:[%s855_s1] sm:$0xff]  ;;  %v166_v54 = vlaneseq }
   0xd   :  { %692 = vset.pattern.permute.xlu0 %v779_v0  ;;  %693 = vset.pattern.permute.xlu1 %v779_v0  ;;  %v656_v2 = vld [vmem:[#allocation2 + $0x20] sm:$0xf0]  ;;  %v655_v3 = vld [vmem:[#allocation2 + $0x1c] sm:$0xf]  ;;  %v535_v5 = vld [vmem:[#allocation2 + $0x24] sm:$0xf0] }
   0xe   :  { %694 = vset.pattern.permute.xlu2 %v779_v0  ;;  %v534_v4 = vor.u32 %v656_v2, %v533_v1  ;;  %v521_v6 = vld [vmem:[#allocation2] sm:$0xf]  ;;  %v653_v7 = vld [vmem:[#allocation2 + $0x8] sm:$0xf0]  ;;  %v538_v8 = vor.u32 %v655_v3, %v535_v5  ;;  %v652_v9 = vld [vmem:[#allocation2 + $0x4] sm:$0xf] }
   0xf   :  { %v523_v10 = vld [vmem:[#allocation2 + $0xc] sm:$0xf0]  ;;  %v522_v11 = vor.u32 %v653_v7, %v521_v6  ;;  %v541_v12 = vld [vmem:[#allocation2 + $0x20] sm:$0xf]  ;;  %v657_v13 = vld [vmem:[#allocation2 + $0x28] sm:$0xf0] }
  0x10   :  { %124 = vmatpush.bf16.msra.mxu2 %v534_v4  ;;  %138 = vmatpush.bf16.msra.mxu1 %v538_v8  ;;  %v526_v15 = vor.u32 %v652_v9, %v523_v10  ;;  %v542_v16 = vor.u32 %v657_v13, %v541_v12  ;;  %v170_v17 = vmul.u32 128, %v59_v14  ;;  %v529_v18 = vld [vmem:[#allocation2 + $0x8] sm:$0xf]  ;;  %v654_v19 = vld [vmem:[#allocation2 + $0x10] sm:$0xf0]  ;;  %v651_v21 = vld [vmem:[%s854_s0] sm:$0xff] }
  0x11   :  { %v673_v20 = vld [vmem:[#allocation5 + $0x78] sm:$0xff]  ;;  %vm114_vm0 = vcmask 261120   ;;  %vm262_vm1 = vcmp.eq.s32.totalorder %v59_v14, 0  ;;  %v672_v25 = vld [vmem:[#allocation5 + $0x70] sm:$0xff]  ;;  %v530_v26 = vor.u32 %v654_v19, %v529_v18  ;;  %vm277_vm3 = vcmp.eq.s32.totalorder %v59_v14, 1  ;;  %v671_v35 = vld [vmem:[#allocation5 + $0x68] sm:$0xff] }
  0x12   :  { %173 = vperm.xlu0 %692, %v170_v17   ;;  %v184_v22 = vadd.s32 128, %v170_v17  ;;  %v665_v23 = vld [vmem:[#allocation5 + $0x38] sm:$0xff]  ;;  %465 = vmatpush.bf16.msra.mxu0 %v673_v20  ;;  %v264_v27 = vsel %vm262_vm1, 1, %v779_v0  ;;  %v279_v31 = vsel %vm277_vm3, 1, %v779_v0  ;;  %vm292_vm5 = vcmp.eq.s32.totalorder %v59_v14, 2  ;;  %v664_v36 = vld [vmem:[#allocation5 + $0x30] sm:$0xff] }
  0x13   :  { %v60_v24 = vld [vmem:[%s855_s1 + $0x8] sm:$0xff]  ;;  %267 = vperm.xlu2 %694, %v264_v27   ;;  %451 = vmatpush.bf16.msra.mxu3 %v665_v23  ;;  %v294_v33 = vsel %vm292_vm5, 1, %v779_v0  ;;  %v670_v37 = vld [vmem:[#allocation5 + $0x60] sm:$0xff]  ;;  %v663_v38 = vld [vmem:[#allocation5 + $0x28] sm:$0xff]  ;;  %v167_v58 = vand.u32 127, %v166_v54  ;;  %s501_s19 = sshll.u32 %s860_s6, 4  ;;  %s502_s19 = int_to_ptr.hbm [resolvable:$true] %s501_s19 }
  0x14   :  { %125 = vmatpush.bf16.msra.mxu2 %v522_v11  ;;  %139 = vmatpush.bf16.msra.mxu1 %v526_v15  ;;  %v171_v28 = vmul.u32 128, %v60_v24  ;;  %vm263_vm2 = vcmp.eq.s32.totalorder %v60_v24, 0  ;;  %vm278_vm4 = vcmp.eq.s32.totalorder %v60_v24, 1  ;;  %vm293_vm6 = vcmp.eq.s32.totalorder %v60_v24, 2  ;;  %v669_v39 = vld [vmem:[#allocation5 + $0x58] sm:$0xff]  ;;  %v662_v40 = vld [vmem:[#allocation5 + $0x20] sm:$0xff] }
  0x15   :  { %187 = vperm.xlu1 %693, %v184_v22   ;;  %v265_v30 = vsel %vm263_vm2, 1, %v779_v0  ;;  %v280_v32 = vsel %vm278_vm4, 1, %v779_v0  ;;  %v295_v34 = vsel %vm293_vm6, 1, %v779_v0  ;;  %v668_v41 = vld [vmem:[#allocation5 + $0x50] sm:$0xff]  ;;  %v661_v42 = vld [vmem:[#allocation5 + $0x18] sm:$0xff]  ;;  %v667_v44 = vld [vmem:[#allocation5 + $0x48] sm:$0xff] }
  0x16   :  { %466 = vmatpush.bf16.msra.mxu0 %v672_v25  ;;  %v185_v29 = vadd.s32 128, %v171_v28  ;;  %v681_v43 = vld [vmem:[#allocation5 + $0xb8] sm:$0xff]  ;;  %v660_v45 = vld [vmem:[#allocation5 + $0x10] sm:$0xff]  ;;  %v666_v47 = vld [vmem:[#allocation5 + $0x40] sm:$0xff]  ;;  %v168_v62 = vadd.s32 128, %v167_v58  ;;  %v169_v17 = vadd.s32 256, %v167_v58 }
  0x17   :  { %543 = vmatmul.msk.bf16.vlgmr.msra.gmra.mxu2 %vm114_vm0, %v651_v21  ;;  %544 = vmatmul.msk.bf16.vlgmr.msra.gmra.mxu1 %vm114_vm0, %v651_v21  ;;  %v680_v46 = vld [vmem:[#allocation5 + $0xb0] sm:$0xff]  ;;  %v659_v48 = vld [vmem:[#allocation5 + $0x8] sm:$0xff]  ;;  %v658_v50 = vld [vmem:[#allocation5] sm:$0xff]  ;;  %s781_s20 = smov 128   ;;  %s782_s21 = smov 8  }
  0x18   :  { %152 = vmatpush.bf16.msrb.mxu2 %v542_v16  ;;  %452 = vmatpush.bf16.msra.mxu3 %v664_v36  ;;  %v679_v49 = vld [vmem:[#allocation5 + $0xa8] sm:$0xff]  ;;  %v678_v51 = vld [vmem:[#allocation5 + $0xa0] sm:$0xff]  ;;  %v677_v52 = vld [vmem:[#allocation5 + $0x98] sm:$0xff] }
  0x19   :  { %479 = vmatpush.bf16.msrb.mxu1 %v681_v43  ;;  %v676_v53 = vld [vmem:[#allocation5 + $0x90] sm:$0xff]  ;;  %v675_v57 = vld [vmem:[#allocation5 + $0x88] sm:$0xff]  ;;  %v674_v61 = vld [vmem:[#allocation5 + $0x80] sm:$0xff] }
  0x1a   :  { %176 = vperm.xlu0 %692, %v171_v28   ;;  %467 = vmatpush.bf16.msra.mxu0 %v671_v35  ;;  %v69_v59 = vld [vmem:[%s857_s3] sm:$0x7] }
  0x1b   :  { %270 = vperm.xlu2 %694, %v265_v30   ;;  %v72_v63 = vperm.slane %v69_v59, 1  ;;  %v71_v4 = vperm.slane %v69_v59, 0  ;;  %v73_v18 = vperm.slane %v69_v59, 2  ;;  %v261_v27 = vld [vmem:[%s859_s5] sm:$0x7]  ;;  %s780_s5 = smov [#allocation7]  }
  0x1c   :  { %153 = vmatpush.bf16.msrb.mxu2 %v530_v26  ;;  %453 = vmatpush.bf16.msra.mxu3 %v663_v38  ;;  %v274_v28 = vperm.slane %v261_v27, 0  ;;  %v289_v30 = vperm.slane %v261_v27, 1  ;;  %s499_s16 = sshll.u32 %s780_s5, 4  ;;  %s500_s16 = int_to_ptr.vmem [resolvable:$true] %s499_s16 }
  0x1d   :  { %190 = vperm.xlu1 %693, %v185_v29   ;;  %480 = vmatpush.bf16.msrb.mxu1 %v680_v46 }
  0x1e   :  { %468 = vmatpush.bf16.msra.mxu0 %v670_v37 }
  0x20   :  { %454 = vmatpush.bf16.msra.mxu3 %v662_v40 }
  0x21   :  { %481 = vmatpush.bf16.msrb.mxu1 %v679_v49 }
  0x22   :  { %282 = vperm.xlu0 %692, %v279_v31   ;;  %469 = vmatpush.bf16.msra.mxu0 %v669_v39 }
  0x23   :  { %297 = vperm.xlu2 %694, %v294_v33   ;;  %v304_v33 = vperm.slane %v261_v27, 2 }
  0x24   :  { %455 = vmatpush.bf16.msra.mxu3 %v661_v42 }
  0x25   :  { %285 = vperm.xlu1 %693, %v280_v32   ;;  %482 = vmatpush.bf16.msrb.mxu1 %v678_v51 }
  0x26   :  { %470 = vmatpush.bf16.msra.mxu0 %v668_v41 }
  0x27   :  { %545 = vmatmul.msk.bf16.vlgmr.msrb.gmra.mxu2 %vm114_vm0, %v651_v21 }
  0x28   :  { %456 = vmatpush.bf16.msra.mxu3 %v660_v45 }
  0x29   :  { %483 = vmatpush.bf16.msrb.mxu1 %v677_v52 }
  0x2a   :  { %300 = vperm.xlu0 %692, %v295_v34   ;;  %471 = vmatpush.bf16.msra.mxu0 %v667_v44 }
  0x2c   :  { %457 = vmatpush.bf16.msra.mxu3 %v659_v48 }
  0x2d   :  { %484 = vmatpush.bf16.msrb.mxu1 %v676_v53 }
  0x2e   :  { %472 = vmatpush.bf16.msra.mxu0 %v666_v47 }
  0x30   :  { %458 = vmatpush.bf16.msra.mxu3 %v658_v50 }
  0x31   :  { %485 = vmatpush.bf16.msrb.mxu1 %v675_v57 }
  0x35   :  { %486 = vmatpush.bf16.msrb.mxu1 %v674_v61 }
  0x6d   :  { %v268_v25 = vpop.permute.xlu2 %267 }
  0x75   :  { %v271_v26 = vpop.permute.xlu2 %270 }
  0x7d   :  { %v298_v32 = vpop.permute.xlu2 %297 }
  0x84   :  { %v174_v55 = vpop.permute.xlu0 %173 }
  0x85   :  { %vm179_vm7 = vcmp.ge.s32.totalorder %v168_v62, %v174_v55  ;;  %vm178_vm13 = vcmp.ge.s32.totalorder %v167_v58, %v174_v55  ;;  %vm180_vm5 = vcmp.ge.s32.totalorder %v169_v17, %v174_v55 }
  0x87   :  { %v188_v56 = vpop.permute.xlu1 %187 }
  0x88   :  { %vm193_vm8 = vcmp.lt.s32.totalorder %v168_v62, %v188_v56  ;;  %vm192_vm14 = vcmp.lt.s32.totalorder %v167_v58, %v188_v56  ;;  %vm194_vm6 = vcmp.lt.s32.totalorder %v169_v17, %v188_v56 }
  0x89   :  { %vm199_vm11 = vmand %vm179_vm7, %vm193_vm8 }
  0x8a   :  { %vm198_vm2 = vmand %vm178_vm13, %vm192_vm14  ;;  %vm302_vm14 = vcmp.eq.s32.totalorder %v298_v32, 1 }
  0x8c   :  { %v177_v0 = vpop.permute.xlu0 %176 }
  0x8d   :  { %vm182_vm9 = vcmp.ge.s32.totalorder %v168_v62, %v177_v0  ;;  %vm181_vm0 = vcmp.ge.s32.totalorder %v167_v58, %v177_v0  ;;  %vm183_vm7 = vcmp.ge.s32.totalorder %v169_v17, %v177_v0 }
  0x8f   :  { %v191_v2 = vpop.permute.xlu1 %190 }
  0x90   :  { %vm196_vm10 = vcmp.lt.s32.totalorder %v168_v62, %v191_v2  ;;  %vm195_vm1 = vcmp.lt.s32.totalorder %v167_v58, %v191_v2  ;;  %vm197_vm8 = vcmp.lt.s32.totalorder %v169_v17, %v191_v2 }
  0x91   :  { %vm202_vm12 = vmand %vm182_vm9, %vm196_vm10 }
  0x92   :  { %vm645_vm15 = vmpackc.low %vm202_vm12, %vm199_vm11  ;;  %vm272_vm12 = vcmp.eq.s32.totalorder %v268_v25, 1 }
  0x93   :  { %vm201_vm3 = vmand %vm181_vm0, %vm195_vm1  ;;  %v275_v31 = vsel %vm272_vm12, %v274_v28, 0.0 }
  0x94   :  { %v141_v60 = vpop.f32.mrf.mxu1  ;;  %vm642_vm4 = vmpackc.low %vm201_vm3, %vm198_vm2  ;;  %v283_v29 = vpop.permute.xlu0 %282 }
  0x95   :  { %v142_v1 = vadd.f32 %v141_v60, %v72_v63  ;;  %vm200_vm9 = vmand %vm180_vm5, %vm194_vm6  ;;  %vm287_vm13 = vcmp.eq.s32.totalorder %v283_v29, 1 }
  0x96   :  { %vm203_vm10 = vmand %vm183_vm7, %vm197_vm8  ;;  %v290_v35 = vsel %vm287_vm13, %v289_v30, %v275_v31 }
  0x97   :  { %v161_v6 = vmax.f32 %v142_v1, 0.0  ;;  %vm648_vm11 = vmpackc.low %vm203_vm10, %vm200_vm9  ;;  %v286_v36 = vpop.permute.xlu1 %285  ;;  %v305_v37 = vsel %vm302_vm14, %v304_v33, %v290_v35 }
  0x98   :  { %vm288_vm0 = vcmp.eq.s32.totalorder %v286_v36, 1 }
  0x9a   :  { %v127_v3 = vpop.f32.mrf.mxu2 }
  0x9b   :  { %v128_v9 = vadd.f32 %v127_v3, %v71_v4 }
  0x9c   :  { %v143_v5 = vpop.f32.mrf.mxu1  ;;  %v301_v40 = vpop.permute.xlu0 %300 }
  0x9d   :  { %v144_v7 = vadd.f32 %v143_v5, %v72_v63  ;;  %v160_v13 = vmax.f32 %v128_v9, 0.0  ;;  %vm303_vm1 = vcmp.eq.s32.totalorder %v301_v40, 1 }
  0x9f   :  { %v164_v8 = vmax.f32 %v144_v7, 0.0 }
  0xa1   :  { %v646_v10 = vpack.c.bf16 %v164_v8, %v161_v6 }
  0xa2   :  { %v129_v11 = vpop.f32.mrf.mxu2 }
  0xa3   :  { %v130_v12 = vadd.f32 %v129_v11, %v71_v4  ;;  %647 = vmatmul.msk.bf16.vlgmr.msra.gmra.mxu0 %vm645_vm15, %v646_v10  ;;  %vm273_vm15 = vcmp.eq.s32.totalorder %v271_v26, 1 }
  0xa4   :  { %v276_v39 = vsel %vm273_vm15, %v274_v28, 0.0 }
  0xa5   :  { %v163_v14 = vmax.f32 %v130_v12, 0.0  ;;  %v291_v42 = vsel %vm288_vm0, %v289_v30, %v276_v39 }
  0xa6   :  { %v306_v47 = vsel %vm303_vm1, %v304_v33, %v291_v42 }
  0xa7   :  { %v643_v15 = vpack.c.bf16 %v163_v14, %v160_v13 }
  0xa9   :  { %644 = vmatmul.msk.bf16.vlgmr.msra.gmra.mxu3 %vm642_vm4, %v643_v15 }
  0xaa   :  { %v155_v16 = vpop.f32.mrf.mxu2 }
  0xab   :  { %v156_v19 = vadd.f32 %v155_v16, %v73_v18 }
  0xad   :  { %v162_v22 = vmax.f32 %v156_v19, 0.0 }
  0xb2   :  { %v157_v20 = vpop.f32.mrf.mxu2 }
  0xb3   :  { %v158_v21 = vadd.f32 %v157_v20, %v73_v18 }
  0xb5   :  { %v165_v23 = vmax.f32 %v158_v21, 0.0 }
  0xb7   :  { %v649_v24 = vpack.c.bf16 %v165_v23, %v162_v22 }
  0xb9   :  { %650 = vmatmul.msk.bf16.vlgmr.msrb.gmra.mxu1 %vm648_vm11, %v649_v24 }
 0x120   :  { %v474_v41 = vpop.f32.mrf.mxu0 }
 0x128   :  { %v476_v49 = vpop.f32.mrf.mxu0 }
 0x12c   :  { %v460_v34 = vpop.f32.mrf.mxu3 }
 0x12d   :  { %v461_v38 = vadd.f32 %v460_v34, %v305_v37 }
 0x12f   :  { %v475_v43 = vadd.f32 %v474_v41, %v461_v38 }
 0x134   :  { %v462_v44 = vpop.f32.mrf.mxu3 }
 0x135   :  { %v463_v48 = vadd.f32 %v462_v44, %v306_v47 }
 0x136   :  { %v488_v45 = vpop.f32.mrf.mxu1 }
 0x137   :  { %v489_v46 = vadd.f32 %v488_v45, %v475_v43  ;;  %v477_v50 = vadd.f32 %v476_v49, %v463_v48 }
 0x139   :  { %493 = vst [vmem:[#allocation7] sm:$0xff] %v489_v46 }
 0x13e   :  { %v490_v51 = vpop.f32.mrf.mxu1 }
 0x13f   :  { %v491_v52 = vadd.f32 %v490_v51, %v477_v50 }
 0x141   :  { %494 = vst [vmem:[#allocation7 + $0x8] sm:$0xff] %v491_v52 }
 0x142   :  { %507 = dma.vmem_to_hbm [thread:$0]  %s500_s16, 256, %s502_s19, [#allocation4], %s781_s20, %s781_s20, %s782_s21  }
 0x143   :  { %771 = dma.done.wait [#allocation4], 256  }
 0x144   :  { %772 = vsyncadd [#allocation4], 4294967040 }
 0x145   :  { %512 = vsyncpa [#allocation3], 1 }
 0x146   :  { %513 = vsyncpa [#allocation6], 1 }
 0x147   :  { %514 = vsyncpa [#allocation4], 1 }

</bundles_post_ra>
